<compile_context>
chip_gen: v7x
topology: tpu7x:2x2x1
jax: 0.10.0
libtpu: 0.0.40
codegen_flags: <defaults>
</compile_context>

<pallas_src>
import jax
import jax.numpy as jnp
from jax.experimental import pallas as pl
from jax.experimental.pallas import tpu as pltpu

D_IN, D_H1, D_H2, D_OUT = 384, 128, 64, 3
D_OUT_PAD = 128  # lane-dense padded output width


def mlp_kernel(x_ref, w1_ref, b1_ref, w2_ref, b2_ref, w3_ref, b3_ref, o_ref):
    # x arrives at its source dtype (f32 here); cast in-register for the MXU.
    x = x_ref[...].astype(jnp.bfloat16)

    # fc1 + bias + ReLU   (bf16 operands, f32 accumulate, f32 elementwise)
    h1 = jnp.dot(x, w1_ref[...], preferred_element_type=jnp.float32)
    h1 = jnp.maximum(h1 + b1_ref[...], 0.0)
    # drop1: identity (inference semantics)

    # fc2 + bias + ReLU
    h2 = jnp.dot(h1.astype(jnp.bfloat16), w2_ref[...],
                 preferred_element_type=jnp.float32)
    h2 = jnp.maximum(h2 + b2_ref[...], 0.0)
    # drop2: identity (inference semantics)

    # fc3 + bias + ReLU (output padded to 128 lanes; cols >= 3 stay zero)
    h3 = jnp.dot(h2.astype(jnp.bfloat16), w3_ref[...],
                 preferred_element_type=jnp.float32)
    o_ref[...] = jnp.maximum(h3 + b3_ref[...], 0.0).astype(o_ref.dtype)


def _round_up(x, m):
    return ((x + m - 1) // m) * m


def _choose_tb(B, tb_max=2048):
    """Batch tile: multiple of 16, capped for VMEM, and >=2 grid blocks when
    possible so the 'parallel' batch axis can feed both v7x TensorCores."""
    tb = min(tb_max, _round_up(max(1, -(-B // 2)), 16))
    return max(16, tb)


def mlp_forward(x, w1, b1, w2, b2, w3, b3, *, tb=None):
    """x: [B, 384] (f32 or bf16). Weights [in, out], biases [1, out]."""
    B = x.shape[0]
    if tb is None:
        tb = _choose_tb(B)
    grid = (pl.cdiv(B, tb),)  # ragged last block: reads padded, writes masked

    # Weights are tiny and VMEM-resident for the whole grid; one-time bf16 cast.
    w1b = w1.astype(jnp.bfloat16)
    w2b = w2.astype(jnp.bfloat16)
    w3b = jnp.pad(w3, ((0, 0), (0, D_OUT_PAD - D_OUT))).astype(jnp.bfloat16)
    b1f = b1.astype(jnp.float32)
    b2f = b2.astype(jnp.float32)
    b3p = jnp.pad(b3.astype(jnp.float32), ((0, 0), (0, D_OUT_PAD - D_OUT)))

    pinned = lambda shape: pl.BlockSpec(shape, lambda i: (0, 0))

    bytes_accessed = (
        B * D_IN * x.dtype.itemsize                      # x stream
        + B * D_OUT_PAD * 2                              # bf16 padded output
        + (D_IN * D_H1 + D_H1 * D_H2 + D_H2 * D_OUT_PAD) * 2  # bf16 weights
        + (D_H1 + D_H2 + D_OUT_PAD) * 4                  # f32 biases
    )
    cost = pl.CostEstimate(
        flops=2 * B * (D_IN * D_H1 + D_H1 * D_H2 + D_H2 * D_OUT_PAD),
        transcendentals=0,
        bytes_accessed=bytes_accessed,
    )

    out = pl.pallas_call(
        mlp_kernel,
        out_shape=jax.ShapeDtypeStruct((B, D_OUT_PAD), jnp.bfloat16),
        grid=grid,
        in_specs=[
            pl.BlockSpec((tb, D_IN), lambda i: (i, 0)),   # x: tiled over batch
            pinned((D_IN, D_H1)),                         # resident weights/biases
            pinned((1, D_H1)),
            pinned((D_H1, D_H2)),
            pinned((1, D_H2)),
            pinned((D_H2, D_OUT_PAD)),
            pinned((1, D_OUT_PAD)),
        ],
        out_specs=pl.BlockSpec((tb, D_OUT_PAD), lambda i: (i, 0)),
        compiler_params=pltpu.CompilerParams(
            dimension_semantics=("parallel",),            # batch blocks independent
            vmem_limit_bytes=32 * 1024 * 1024,            # safe on v7x (64 MiB) / v5e
        ),
        cost_estimate=cost,
    )(x, w1b, b1f, w2b, b2f, w3b, b3p)

    # Slice the 3 real logits and upcast; fuses with surrounding HLO under jit.
    return out[:, :D_OUT].astype(jnp.float32)


def init_params(key):
    """Deterministic init mimicking nn.Linear default (uniform +/- 1/sqrt(fan_in))."""
    ks = jax.random.split(key, 6)

    def linear(kw, kb, fan_in, fan_out):
        bound = 1.0 / jnp.sqrt(fan_in)
        # stored as [in, out] so the kernel does x @ W
        w = jax.random.uniform(kw, (fan_in, fan_out), jnp.float32, -bound, bound)
        b = jax.random.uniform(kb, (1, fan_out), jnp.float32, -bound, bound)
        return w, b

    w1, b1 = linear(ks[0], ks[1], D_IN, D_H1)
    w2, b2 = linear(ks[2], ks[3], D_H1, D_H2)
    w3, b3 = linear(ks[4], ks[5], D_H2, D_OUT)
    return w1, b1, w2, b2, w3, b3


def ref_forward(x, w1, b1, w2, b2, w3, b3):
    """Plain-JAX reference with the same bf16-operand / f32-accumulate math."""
    h = jnp.dot(x.astype(jnp.bfloat16), w1.astype(jnp.bfloat16),
                preferred_element_type=jnp.float32)
    h = jnp.maximum(h + b1, 0.0)
    h = jnp.dot(h.astype(jnp.bfloat16), w2.astype(jnp.bfloat16),
                preferred_element_type=jnp.float32)
    h = jnp.maximum(h + b2, 0.0)
    h = jnp.dot(h.astype(jnp.bfloat16), w3.astype(jnp.bfloat16),
                preferred_element_type=jnp.float32)
    return jnp.maximum(h + b3, 0.0)


if __name__ == "__main__":
    key = jax.random.PRNGKey(0)
    k_x, k_p = jax.random.split(key)

    # Small batch; 250 is deliberately NOT a multiple of the chosen tile (128)
    # so it exercises 2 grid steps AND the masked ragged last block.
    B = 250
    x = jax.random.normal(k_x, (B, D_IN), jnp.float32)
    params = init_params(k_p)

    fwd = jax.jit(mlp_forward)
    out = jax.block_until_ready(fwd(x, *params))

    # Match the kernel's bf16 output rounding in the reference before comparing.
    ref = ref_forward(x, *params).astype(jnp.bfloat16).astype(jnp.float32)
    assert out.shape == (B, D_OUT), out.shape
    assert jnp.allclose(out, ref, atol=2e-2, rtol=2e-2), float(
        jnp.max(jnp.abs(out - ref)))

    print("KERNEL_OK")
</pallas_src>

<mosaic_0001>
module attributes {stable_mosaic.version = 11 : i64} {
  func.func @mlp_kernel(%arg0: i32, %arg1: memref<128x384xf32, #tpu.memory_space<vmem>>, %arg2: memref<384x128xbf16, #tpu.memory_space<vmem>>, %arg3: memref<1x128xf32, #tpu.memory_space<vmem>>, %arg4: memref<128x64xbf16, #tpu.memory_space<vmem>>, %arg5: memref<1x64xf32, #tpu.memory_space<vmem>>, %arg6: memref<64x128xbf16, #tpu.memory_space<vmem>>, %arg7: memref<1x128xf32, #tpu.memory_space<vmem>>, %arg8: memref<128x128xbf16, #tpu.memory_space<vmem>>) attributes {dimension_semantics = [#tpu.dimension_semantics<parallel>], iteration_bounds = array<i64: 2>, scalar_prefetch = 0 : i64, scratch_operands = 0 : i64, tpu.core_type = #tpu.core_type<tc>, window_params = [{transform_indices = @transform_0, window_bounds = array<i64: 128, 384>}, {pipeline_mode = #tpu.pipeline_mode<synchronous>, transform_indices = @transform_1, window_bounds = array<i64: 384, 128>}, {pipeline_mode = #tpu.pipeline_mode<synchronous>, transform_indices = @transform_2, window_bounds = array<i64: 1, 128>}, {pipeline_mode = #tpu.pipeline_mode<synchronous>, transform_indices = @transform_3, window_bounds = array<i64: 128, 64>}, {pipeline_mode = #tpu.pipeline_mode<synchronous>, transform_indices = @transform_4, window_bounds = array<i64: 1, 64>}, {pipeline_mode = #tpu.pipeline_mode<synchronous>, transform_indices = @transform_5, window_bounds = array<i64: 64, 128>}, {pipeline_mode = #tpu.pipeline_mode<synchronous>, transform_indices = @transform_6, window_bounds = array<i64: 1, 128>}, {transform_indices = @transform_7, window_bounds = array<i64: 128, 128>}]} {
    %c0 = arith.constant 0 : index
    %c0_0 = arith.constant 0 : index
    %0 = vector.load %arg1[%c0, %c0_0] : memref<128x384xf32, #tpu.memory_space<vmem>>, vector<128x384xf32>
    %1 = arith.truncf %0 : vector<128x384xf32> to vector<128x384xbf16>
    %c0_1 = arith.constant 0 : index
    %c0_2 = arith.constant 0 : index
    %2 = vector.load %arg2[%c0_1, %c0_2] : memref<384x128xbf16, #tpu.memory_space<vmem>>, vector<384x128xbf16>
    %cst = arith.constant dense<0.000000e+00> : vector<128x128xf32>
    %3 = tpu.matmul %1, %2, %cst {dimension_numbers = #tpu.dot_dimension_numbers<[1], [0], [0], [1], [0, 0, 1, 1], [], []>} : vector<128x384xbf16>, vector<384x128xbf16>, vector<128x128xf32> -> vector<128x128xf32>
    %c0_3 = arith.constant 0 : index
    %c0_4 = arith.constant 0 : index
    %4 = vector.load %arg3[%c0_3, %c0_4] : memref<1x128xf32, #tpu.memory_space<vmem>>, vector<1x128xf32>
    %5 = vector.broadcast %4 : vector<1x128xf32> to vector<128x128xf32>
    %6 = arith.addf %3, %5 : vector<128x128xf32>
    %cst_5 = arith.constant 0.000000e+00 : f32
    %7 = vector.broadcast %cst_5 : f32 to vector<128x128xf32>
    %8 = arith.maximumf %6, %7 : vector<128x128xf32>
    %9 = arith.truncf %8 : vector<128x128xf32> to vector<128x128xbf16>
    %c0_6 = arith.constant 0 : index
    %c0_7 = arith.constant 0 : index
    %10 = vector.load %arg4[%c0_6, %c0_7] : memref<128x64xbf16, #tpu.memory_space<vmem>>, vector<128x64xbf16>
    %cst_8 = arith.constant dense<0.000000e+00> : vector<128x64xf32>
    %11 = tpu.matmul %9, %10, %cst_8 {dimension_numbers = #tpu.dot_dimension_numbers<[1], [0], [0], [1], [0, 0, 1, 1], [], []>} : vector<128x128xbf16>, vector<128x64xbf16>, vector<128x64xf32> -> vector<128x64xf32>
    %c0_9 = arith.constant 0 : index
    %c0_10 = arith.constant 0 : index
    %12 = vector.load %arg5[%c0_9, %c0_10] : memref<1x64xf32, #tpu.memory_space<vmem>>, vector<1x64xf32>
    %13 = vector.broadcast %12 : vector<1x64xf32> to vector<128x64xf32>
    %14 = arith.addf %11, %13 : vector<128x64xf32>
    %cst_11 = arith.constant 0.000000e+00 : f32
    %15 = vector.broadcast %cst_11 : f32 to vector<128x64xf32>
    %16 = arith.maximumf %14, %15 : vector<128x64xf32>
    %17 = arith.truncf %16 : vector<128x64xf32> to vector<128x64xbf16>
    %c0_12 = arith.constant 0 : index
    %c0_13 = arith.constant 0 : index
    %18 = vector.load %arg6[%c0_12, %c0_13] : memref<64x128xbf16, #tpu.memory_space<vmem>>, vector<64x128xbf16>
    %cst_14 = arith.constant dense<0.000000e+00> : vector<128x128xf32>
    %19 = tpu.matmul %17, %18, %cst_14 {dimension_numbers = #tpu.dot_dimension_numbers<[1], [0], [0], [1], [0, 0, 1, 1], [], []>} : vector<128x64xbf16>, vector<64x128xbf16>, vector<128x128xf32> -> vector<128x128xf32>
    %c0_15 = arith.constant 0 : index
    %c0_16 = arith.constant 0 : index
    %20 = vector.load %arg7[%c0_15, %c0_16] : memref<1x128xf32, #tpu.memory_space<vmem>>, vector<1x128xf32>
    %21 = vector.broadcast %20 : vector<1x128xf32> to vector<128x128xf32>
    %22 = arith.addf %19, %21 : vector<128x128xf32>
    %cst_17 = arith.constant 0.000000e+00 : f32
    %23 = vector.broadcast %cst_17 : f32 to vector<128x128xf32>
    %24 = arith.maximumf %22, %23 : vector<128x128xf32>
    %25 = arith.truncf %24 : vector<128x128xf32> to vector<128x128xbf16>
    %c0_18 = arith.constant 0 : index
    %c0_19 = arith.constant 0 : index
    %26 = vector.load %arg8[%c0_18, %c0_19] : memref<128x128xbf16, #tpu.memory_space<vmem>>, vector<128x128xbf16>
    tpu.vector_store %arg8[%c0_18, %c0_19], %25 {strides = array<i32>} : memref<128x128xbf16, #tpu.memory_space<vmem>>, vector<128x128xbf16>,
    return
  }
  func.func @transform_0(%arg0: i32) -> (i32, i32) {
    %c0_i32 = arith.constant 0 : i32
    %c0_i32_0 = arith.constant 0 : i32
    return %arg0, %c0_i32 : i32, i32
  }
  func.func @transform_1(%arg0: i32) -> (i32, i32) {
    %c0_i32 = arith.constant 0 : i32
    %c0_i32_0 = arith.constant 0 : i32
    %c0_i32_1 = arith.constant 0 : i32
    return %c0_i32, %c0_i32_0 : i32, i32
  }
  func.func @transform_2(%arg0: i32) -> (i32, i32) {
    %c0_i32 = arith.constant 0 : i32
    %c0_i32_0 = arith.constant 0 : i32
    %c0_i32_1 = arith.constant 0 : i32
    return %c0_i32, %c0_i32_0 : i32, i32
  }
  func.func @transform_3(%arg0: i32) -> (i32, i32) {
    %c0_i32 = arith.constant 0 : i32
    %c0_i32_0 = arith.constant 0 : i32
    %c0_i32_1 = arith.constant 0 : i32
    return %c0_i32, %c0_i32_0 : i32, i32
  }
  func.func @transform_4(%arg0: i32) -> (i32, i32) {
    %c0_i32 = arith.constant 0 : i32
    %c0_i32_0 = arith.constant 0 : i32
    %c0_i32_1 = arith.constant 0 : i32
    return %c0_i32, %c0_i32_0 : i32, i32
  }
  func.func @transform_5(%arg0: i32) -> (i32, i32) {
    %c0_i32 = arith.constant 0 : i32
    %c0_i32_0 = arith.constant 0 : i32
    %c0_i32_1 = arith.constant 0 : i32
    return %c0_i32, %c0_i32_0 : i32, i32
  }
  func.func @transform_6(%arg0: i32) -> (i32, i32) {
    %c0_i32 = arith.constant 0 : i32
    %c0_i32_0 = arith.constant 0 : i32
    %c0_i32_1 = arith.constant 0 : i32
    return %c0_i32, %c0_i32_0 : i32, i32
  }
  func.func @transform_7(%arg0: i32) -> (i32, i32) {
    %c0_i32 = arith.constant 0 : i32
    %c0_i32_0 = arith.constant 0 : i32
    return %arg0, %c0_i32 : i32, i32
  }
}

</mosaic_0001>

<bundles_post_ra>
// kernel: mlp_forward.1
= control target key start
LH: loop header
LB: loop body
LE: loop exit
PB: predicated region body
PF: predicated region fallthrough
CT: control target
= control target key end

     0   :  { %s1714_s24 = smov 0   ;;  %s1947_s0 = inlined_call_operand.vmem [shape: f32[250,384], index: 0, kind: input, shape index: {}]   ;;  %s1948_s1 = inlined_call_operand.vmem [shape: bf16[384,128], index: 1, kind: input, shape index: {}]   ;;  %s1949_s2 = inlined_call_operand.vmem [shape: f32[1,128], index: 2, kind: input, shape index: {}]   ;;  %s1950_s3 = inlined_call_operand.vmem [shape: bf16[128,64], index: 3, kind: input, shape index: {}]   ;;  %s1951_s4 = inlined_call_operand.vmem [shape: f32[1,64], index: 4, kind: input, shape index: {}]   ;;  %s1952_s5 = inlined_call_operand.vmem [shape: bf16[64,128], index: 5, kind: input, shape index: {}]   ;;  %s1953_s6 = inlined_call_operand.vmem [shape: f32[1,128], index: 6, kind: input, shape index: {}]   ;;  %s1954_s7 = inlined_call_operand.vmem [shape: bf16[250,128], index: 7, kind: output, shape index: {}]  }
   0x1 LB: > { %s1280_s25 = sadd.s32 4294967295, %s1672_s24   ;;  %p1284_p0 = scmp.ge.s32.totalorder %s1672_s24, 1  ;;  %s1672_s24 = sphi %s1714_s24, %s17_s24  }
   0x2   : > { %p239_p1 = scmp.lt.s32.totalorder %s1672_s24, 3 }
   0x4   : > { %p240_p2 = pnand %p1284_p0, %p239_p1 }
   0x5   : > { %v1630_v0 = vld [vmem:[%s1948_s1 + $0x40] sm:$0xff] (!%p240_p2)   ;;  %v1632_v2 = vld [vmem:[%s1948_s1 + $0x48] sm:$0xff] (!%p240_p2)   ;;  %v1635_v5 = vld [vmem:[%s1948_s1 + $0x50] sm:$0xff] (!%p240_p2)   ;;  %s1285_s15 = sshll.u32 (!%p240_p2), %s1280_s25, 4  ;;  %vm1006_vm0 = vcmask (!%p240_p2), 523264  }
   0x6   : > { %243 = sbr.rel (%p240_p2) target bundleno = 763 (0x2fb), region = 48  ;;  %v1631_v1 = vld [vmem:[%s1948_s1] sm:$0xff] (!%p240_p2)   ;;  %1417 = vmatprep.subr.bf16.mxu0 (!%p240_p2), %v1630_v0  ;;  %v1634_v4 = vld [vmem:[%s1948_s1 + $0x8] sm:$0xff] (!%p240_p2)   ;;  %v1637_v7 = vld [vmem:[%s1948_s1 + $0x10] sm:$0xff] (!%p240_p2)   ;;  %p273_p3 = scmp.lt.s32.totalorder (!%p240_p2), %s1285_s15, 31 }
   0x7   : > { %1418 = vmatpush3.bf16.msra.mxu0 (!%p240_p2), %v1631_v1  ;;  %v1633_v3 = vld [vmem:[%s1948_s1 + $0x80] sm:$0xff] (!%p240_p2)   ;;  %v1636_v6 = vld [vmem:[%s1948_s1 + $0x88] sm:$0xff] (!%p240_p2)   ;;  %v1638_v8 = vld [vmem:[%s1948_s1 + $0x58] sm:$0xff] (!%p240_p2)  }
   0x8   : > { %1419 = vmatprep.subr.bf16.mxu0 (!%p240_p2), %v1632_v2  ;;  %1525 = vmatprep.subr.bf16.mxu1 (!%p240_p2), %v1633_v3  ;;  %v1639_v9 = vld [vmem:[%s1948_s1 + $0x90] sm:$0xff] (!%p240_p2)   ;;  %v1640_v10 = vld [vmem:[%s1948_s1 + $0x18] sm:$0xff] (!%p240_p2)   ;;  %v1641_v11 = vld [vmem:[%s1948_s1 + $0x60] sm:$0xff] (!%p240_p2)  }
   0x9   : > { %1526 = vmatpush3.bf16.msra.mxu1 (!%p240_p2), %v1633_v3  ;;  %v1642_v12 = vld [vmem:[%s1948_s1 + $0x98] sm:$0xff] (!%p240_p2)   ;;  %v1643_v13 = vld [vmem:[%s1948_s1 + $0x20] sm:$0xff] (!%p240_p2)   ;;  %v1644_v15 = vld [vmem:[%s1948_s1 + $0x68] sm:$0xff] (!%p240_p2)  }
   0xa   : > { %1527 = vmatprep.subr.bf16.mxu1 (!%p240_p2), %v1636_v6  ;;  %v1645_v14 = vld [vmem:[%s1948_s1 + $0xa0] sm:$0xff] (!%p240_p2)   ;;  %v1646_v16 = vld [vmem:[%s1948_s1 + $0x28] sm:$0xff] (!%p240_p2)   ;;  %v1647_v18 = vld [vmem:[%s1948_s1 + $0x70] sm:$0xff] (!%p240_p2)  }
   0xb   : > { %1420 = vmatpush3.bf16.msra.mxu0 (!%p240_p2), %v1634_v4  ;;  %v1648_v17 = vld [vmem:[%s1948_s1 + $0xa8] sm:$0xff] (!%p240_p2)   ;;  %v1649_v19 = vld [vmem:[%s1948_s1 + $0x30] sm:$0xff] (!%p240_p2)   ;;  %v1650_v23 = vld [vmem:[%s1948_s1 + $0x78] sm:$0xff] (!%p240_p2)  }
   0xc   : > { %1421 = vmatprep.subr.bf16.mxu0 (!%p240_p2), %v1635_v5  ;;  %v1651_v20 = vld [vmem:[%s1948_s1 + $0xb0] sm:$0xff] (!%p240_p2)   ;;  %v1652_v27 = vld [vmem:[%s1948_s1 + $0x38] sm:$0xff] (!%p240_p2)   ;;  %v1654_v52 = vld [vmem:[%s1950_s3] sm:$0xff] (!%p240_p2)  }
   0xd   : > { %1528 = vmatpush3.bf16.msra.mxu1 %v1636_v6  ;;  %s1956_s15 = smov (!%p273_p3, %s1285_s15), 31  ;;  %v1653_v31 = vld [vmem:[%s1948_s1 + $0xb8] sm:$0xff]   ;;  %v1655_v56 = vld [vmem:[%s1950_s3 + $0x8] sm:$0xff]   ;;  %v1656_v60 = vld [vmem:[%s1950_s3 + $0x10] sm:$0xff]  }
   0xe   : > { %1529 = vmatprep.subr.bf16.mxu1 %v1639_v9  ;;  %s1621_s14 = smul.u32 24, %s1956_s15  ;;  %s1288_s23 = sshll.u32 %s1956_s15, 2 }
   0xf   : > { %1422 = vmatpush3.bf16.msra.mxu0 %v1637_v7 }
  0x10   : > { %1423 = vmatprep.subr.bf16.mxu0 %v1638_v8  ;;  %s1785_s25 = scalar_lea.vmem %s1947_s0, %s1621_s14 }
  0x11   : > { %1530 = vmatpush3.bf16.msra.mxu1 %v1639_v9  ;;  %v287_v21 = vld [vmem:[%s1785_s25 + $0x8] sm:$0xff]  ;;  %v290_v22 = vld [vmem:[%s1785_s25 + $0x20] sm:$0xff]  ;;  %v288_v25 = vld [vmem:[%s1785_s25 + $0x10] sm:$0xff] }
  0x12   : > { %1531 = vmatprep.subr.bf16.mxu1 %v1642_v12  ;;  %v335_v24 = vpack.c.bf16 %v290_v22, %v287_v21  ;;  %v291_v26 = vld [vmem:[%s1785_s25 + $0x28] sm:$0xff]  ;;  %v286_v29 = vld [vmem:[%s1785_s25] sm:$0xff]  ;;  %v289_v30 = vld [vmem:[%s1785_s25 + $0x18] sm:$0xff] }
  0x13   : > { %1424 = vmatpush3.bf16.msra.mxu0 %v1640_v10  ;;  %v336_v28 = vpack.c.bf16 %v291_v26, %v288_v25  ;;  %v293_v32 = vld [vmem:[%s1785_s25 + $0x38] sm:$0xff]  ;;  %v296_v33 = vld [vmem:[%s1785_s25 + $0x50] sm:$0xff]  ;;  %v334_v34 = vpack.c.bf16 %v289_v30, %v286_v29  ;;  %v294_v35 = vld [vmem:[%s1785_s25 + $0x40] sm:$0xff] }
  0x14   : > { %1425 = vmatprep.subr.bf16.mxu0 %v1641_v11  ;;  %589 = vmatprep.mubr.bf16.mxu0 %v335_v24  ;;  %v297_v36 = vld [vmem:[%s1785_s25 + $0x58] sm:$0xff]  ;;  %v338_v37 = vpack.c.bf16 %v296_v33, %v293_v32  ;;  %v300_v38 = vld [vmem:[%s1785_s25 + $0x70] sm:$0xff]  ;;  %v303_v39 = vld [vmem:[%s1785_s25 + $0x88] sm:$0xff] }
  0x15   : > { %1532 = vmatpush3.bf16.msra.mxu1 %v1642_v12  ;;  %1541 = vmatprep.mubr.bf16.mxu1 %v336_v28  ;;  %v339_v40 = vpack.c.bf16 %v297_v36, %v294_v35  ;;  %v342_v41 = vpack.c.bf16 %v303_v39, %v300_v38  ;;  %v292_v42 = vld [vmem:[%s1785_s25 + $0x30] sm:$0xff]  ;;  %v295_v43 = vld [vmem:[%s1785_s25 + $0x48] sm:$0xff]  ;;  %v302_v45 = vld [vmem:[%s1785_s25 + $0x80] sm:$0xff] }
  0x16   : > { %1533 = vmatprep.subr.bf16.mxu1 %v1645_v14  ;;  %v299_v44 = vld [vmem:[%s1785_s25 + $0x68] sm:$0xff]  ;;  %v337_v46 = vpack.c.bf16 %v295_v43, %v292_v42  ;;  %v306_v47 = vld [vmem:[%s1785_s25 + $0xa0] sm:$0xff]  ;;  %v309_v48 = vld [vmem:[%s1785_s25 + $0xb8] sm:$0xff] }
  0x17   : > { %1426 = vmatpush3.bf16.msra.mxu0 %v1643_v13  ;;  %v341_v49 = vpack.c.bf16 %v302_v45, %v299_v44  ;;  %v312_v50 = vld [vmem:[%s1785_s25 + $0xd0] sm:$0xff]  ;;  %v315_v51 = vld [vmem:[%s1785_s25 + $0xe8] sm:$0xff]  ;;  %v298_v53 = vld [vmem:[%s1785_s25 + $0x60] sm:$0xff]  ;;  %v345_v55 = vpack.c.bf16 %v309_v48, %v306_v47 }
  0x18   : > { %1427 = vmatprep.subr.bf16.mxu0 %v1644_v15  ;;  %v301_v54 = vld [vmem:[%s1785_s25 + $0x78] sm:$0xff]  ;;  %v308_v58 = vld [vmem:[%s1785_s25 + $0xb0] sm:$0xff]  ;;  %v348_v59 = vpack.c.bf16 %v315_v51, %v312_v50  ;;  %v318_v61 = vld [vmem:[%s1785_s25 + $0x100] sm:$0xff] }
  0x19   : > { %1534 = vmatpush3.bf16.msra.mxu1 %v1645_v14  ;;  %v305_v57 = vld [vmem:[%s1785_s25 + $0x98] sm:$0xff]  ;;  %v324_v63 = vld [vmem:[%s1785_s25 + $0x130] sm:$0xff]  ;;  %v327_v0 = vld [vmem:[%s1785_s25 + $0x148] sm:$0xff]  ;;  %v340_v1 = vpack.c.bf16 %v301_v54, %v298_v53 }
  0x1a   : > { %1535 = vmatprep.subr.bf16.mxu1 %v1648_v17  ;;  %v321_v62 = vld [vmem:[%s1785_s25 + $0x118] sm:$0xff]  ;;  %v344_v2 = vpack.c.bf16 %v308_v58, %v305_v57  ;;  %v354_v4 = vpack.c.bf16 %v327_v0, %v324_v63  ;;  %v304_v5 = vld [vmem:[%s1785_s25 + $0x90] sm:$0xff]  ;;  %v307_v6 = vld [vmem:[%s1785_s25 + $0xa8] sm:$0xff] }
  0x1b   : > { %1428 = vmatpush3.bf16.msra.mxu0 %v1646_v16  ;;  %v351_v3 = vpack.c.bf16 %v321_v62, %v318_v61  ;;  %v311_v7 = vld [vmem:[%s1785_s25 + $0xc8] sm:$0xff]  ;;  %v314_v8 = vld [vmem:[%s1785_s25 + $0xe0] sm:$0xff]  ;;  %v343_v9 = vpack.c.bf16 %v307_v6, %v304_v5  ;;  %v333_v11 = vld [vmem:[%s1785_s25 + $0x178] sm:$0xff] }
  0x1c   : > { %1429 = vmatprep.subr.bf16.mxu0 %v1647_v18  ;;  %v330_v10 = vld [vmem:[%s1785_s25 + $0x160] sm:$0xff]  ;;  %v347_v12 = vpack.c.bf16 %v314_v8, %v311_v7  ;;  %v313_v15 = vld [vmem:[%s1785_s25 + $0xd8] sm:$0xff]  ;;  %v319_v21 = vld [vmem:[%s1785_s25 + $0x108] sm:$0xff] }
  0x1d   : > { %1536 = vmatpush3.bf16.msra.mxu1 %v1648_v17  ;;  %v357_v13 = vpack.c.bf16 %v333_v11, %v330_v10  ;;  %v310_v14 = vld [vmem:[%s1785_s25 + $0xc0] sm:$0xff]  ;;  %v317_v16 = vld [vmem:[%s1785_s25 + $0xf8] sm:$0xff]  ;;  %v320_v17 = vld [vmem:[%s1785_s25 + $0x110] sm:$0xff] }
  0x1e   : > { %1537 = vmatprep.subr.bf16.mxu1 %v1651_v20  ;;  %v346_v18 = vpack.c.bf16 %v313_v15, %v310_v14  ;;  %v323_v22 = vld [vmem:[%s1785_s25 + $0x128] sm:$0xff]  ;;  %v322_v26 = vld [vmem:[%s1785_s25 + $0x120] sm:$0xff]  ;;  %v329_v28 = vld [vmem:[%s1785_s25 + $0x158] sm:$0xff] }
  0x1f   : > { %1430 = vmatpush3.bf16.msra.mxu0 %v1649_v19  ;;  %v350_v19 = vpack.c.bf16 %v320_v17, %v317_v16  ;;  %v332_v29 = vld [vmem:[%s1785_s25 + $0x170] sm:$0xff]  ;;  %v331_v33 = vld [vmem:[%s1785_s25 + $0x168] sm:$0xff]  ;;  %v1657_v35 = vld [vmem:[%s1950_s3 + $0x18] sm:$0xff]  }
  0x20   : > { %1431 = vmatprep.subr.bf16.mxu0 %v1650_v23  ;;  %v326_v23 = vld [vmem:[%s1785_s25 + $0x140] sm:$0xff]  ;;  %v328_v32 = vld [vmem:[%s1785_s25 + $0x150] sm:$0xff]  ;;  %v1661_v39 = vld [vmem:[%s1950_s3 + $0x38] sm:$0xff]  }
  0x21   : > { %1538 = vmatpush3.bf16.msra.mxu1 %v1651_v20  ;;  %v316_v20 = vld [vmem:[%s1785_s25 + $0xf0] sm:$0xff]  ;;  %v353_v25 = vpack.c.bf16 %v326_v23, %v323_v22  ;;  %v1658_v36 = vld [vmem:[%s1950_s3 + $0x20] sm:$0xff]  }
  0x22   : > { %1539 = vmatprep.subr.bf16.mxu1 %v1653_v31  ;;  %v349_v24 = vpack.c.bf16 %v319_v21, %v316_v20  ;;  %v1660_v38 = vld [vmem:[%s1950_s3 + $0x30] sm:$0xff]   ;;  %v1887_v44 = vld [vmem:[%s1949_s2] ss:$0 sm:$0xff] }
  0x23   : > { %1432 = vmatpush3.bf16.msra.mxu0 %v1652_v27  ;;  %v325_v27 = vld [vmem:[%s1785_s25 + $0x138] sm:$0xff]  ;;  %s1934_s25 = scalar_lea.vmem %s1954_s7, %s1288_s23 }
  0x24   : > { %v352_v30 = vpack.c.bf16 %v325_v27, %v322_v26 }
  0x25   : > { %1540 = vmatpush3.bf16.msra.mxu1 %v1653_v31  ;;  %v356_v31 = vpack.c.bf16 %v332_v29, %v329_v28 }
  0x26   : > { %590 = vmatmul.mubr.bf16.vlgmr.msra.gmra.mrb[0].mxu0 %v334_v34  ;;  %1557 = vmatprep.subr.bf16.mxu1 %v1654_v52  ;;  %v355_v34 = vpack.c.bf16 %v331_v33, %v328_v32 }
  0x27   : > { %597 = vmatprep.mubr.bf16.mxu0 %v338_v37  ;;  %v1659_v37 = vld [vmem:[%s1950_s3 + $0x28] sm:$0xff]  }
  0x28   : > { %1542 = vmatmul.mubr.bf16.vlgmr.msra.gmra.mrb[0].mxu1 %v339_v40  ;;  %v1662_v40 = vld [vmem:[%s1952_s5] sm:$0xff]  }
  0x29   : > { %1545 = vmatprep.mubr.bf16.mxu1 %v342_v41  ;;  %1558 = vmatpush3.bf16.msra.mxu1 %v1654_v52  ;;  %v1880_v41 = vld [vmem:[%s1952_s5 + $0x8] sm:$0xff]  }
  0x2a   : > { %1559 = vmatprep.subr.bf16.mxu1 %v1655_v56  ;;  %1589 = vmatprep.subr.bf16.mxu0 %v1662_v40 }
  0x2b   : > { %1590 = vmatpush3.bf16.msra.mxu0 %v1662_v40 }
  0x2c   : > { %1591 = vmatprep.subr.bf16.mxu0 %v1880_v41 }
  0x2d   : > { %1560 = vmatpush3.bf16.msra.mxu1 %v1655_v56 }
  0x2e   : > { %598 = vmatmul.mubr.bf16.gmra.mrb[4].mxu0 %v337_v46  ;;  %1561 = vmatprep.subr.bf16.mxu1 %v1656_v60 }
  0x2f   : > { %605 = vmatprep.mubr.bf16.mxu0 %v341_v49  ;;  %1592 = vmatpush3.bf16.msra.mxu0 %v1880_v41 }
  0x30   : > { %1546 = vmatmul.mubr.bf16.gmra.mrb[4].mxu1 %v345_v55 }
  0x31   : > { %1549 = vmatprep.mubr.bf16.mxu1 %v348_v59  ;;  %1562 = vmatpush3.bf16.msra.mxu1 %v1656_v60 }
  0x32   : > { %1563 = vmatprep.subr.bf16.mxu1 %v1657_v35 }
  0x35   : > { %1564 = vmatpush3.bf16.msra.mxu1 %v1657_v35 }
  0x36   : > { %606 = vmatmul.mubr.bf16.gmra.mrb[8].mxu0 %v340_v1  ;;  %1565 = vmatprep.subr.bf16.mxu1 %v1658_v36 }
  0x37   : > { %613 = vmatprep.mubr.bf16.mxu0 %v344_v2 }
  0x38   : > { %1550 = vmatmul.mubr.bf16.gmra.mrb[8].mxu1 %v351_v3 }
  0x39   : > { %1553 = vmatprep.mubr.bf16.mxu1 %v354_v4  ;;  %1566 = vmatpush3.bf16.msra.mxu1 %v1658_v36 }
  0x3a   : > { %1567 = vmatprep.subr.bf16.mxu1 %v1659_v37 }
  0x3d   : > { %1568 = vmatpush3.bf16.msra.mxu1 %v1659_v37 }
  0x3e   : > { %614 = vmatmul.mubr.bf16.gmra.mrb[12].mxu0 %v343_v9  ;;  %1569 = vmatprep.subr.bf16.mxu1 %v1660_v38 }
  0x3f   : > { %621 = vmatprep.mubr.bf16.mxu0 %v347_v12 }
  0x40   : > { %1554 = vmatmul.mubr.bf16.gmra.mrb[12].mxu1 %v357_v13 }
  0x41   : > { %1570 = vmatpush3.bf16.msra.mxu1 %v1660_v38 }
  0x42   : > { %1571 = vmatprep.subr.bf16.mxu1 %v1661_v39 }
  0x45   : > { %1572 = vmatpush3.bf16.msra.mxu1 %v1661_v39 }
  0x46   : > { %622 = vmatmul.mubr.bf16.gmra.mrb[16].mxu0 %v346_v18  ;;  %1613 = vmatprep.subr.bf16.mxu1 %v1662_v40 }
  0x47   : > { %629 = vmatprep.mubr.bf16.mxu0 %v350_v19 }
  0x4e   : > { %630 = vmatmul.mubr.bf16.gmra.mrb[20].mxu0 %v349_v24 }
  0x4f   : > { %637 = vmatprep.mubr.bf16.mxu0 %v353_v25 }
  0x56   : > { %638 = vmatmul.mubr.bf16.gmra.mrb[24].mxu0 %v352_v30 }
  0x57   : > { %645 = vmatprep.mubr.bf16.mxu0 %v356_v31 }
  0x5e   : > { %646 = vmatmul.mubr.bf16.gmra.mrb[28].mxu0 %v355_v34 }
  0xf9   : > { %v1433_v42 = vpop.f32.mrb[0].mxu0 }
  0xfa   : > { %v1434_v43 = vpop.f32.mrb[1].mxu0 }
  0xfb   : > { %v1435_v45 = vadd.f32 %v1434_v43, %v1433_v42  ;;  %v1436_v46 = vpop.f32.mrb[2].mxu0  ;;  %v1543_v48 = vpop.f32.mrb[0].mxu1 }
  0xfc   : > { %v1437_v47 = vpop.f32.mrb[3].mxu0  ;;  %v688_v51 = vpop.f32.mrb[1].mxu1 }
  0xfd   : > { %v1438_v49 = vadd.f32 %v1437_v47, %v1436_v46  ;;  %v592_v50 = vadd.f32 %v1435_v45, %v1887_v44  ;;  %v1544_v52 = vpop.f32.mrb[2].mxu1 }
  0xfe   : > { %v691_v55 = vpop.f32.mrb[3].mxu1 }
  0xff   : > { %v689_v53 = vadd.f32 %v688_v51, %v592_v50  ;;  %v595_v54 = vadd.f32 %v1438_v49, %v1887_v44 }
 0x101   : > { %v692_v56 = vadd.f32 %v691_v55, %v595_v54  ;;  %v1439_v57 = vpop.f32.mrb[4].mxu0  ;;  %v751_v59 = vmax.f32 %v689_v53, 0.0 }
 0x102   : > { %v1440_v58 = vpop.f32.mrb[5].mxu0 }
 0x103   : > { %v752_v60 = vmax.f32 %v692_v56, 0.0  ;;  %v1441_v61 = vadd.f32 %v1440_v58, %v1439_v57  ;;  %v1442_v62 = vpop.f32.mrb[6].mxu0  ;;  %v1547_v0 = vpop.f32.mrb[4].mxu1 }
 0x104   : > { %v1443_v63 = vpop.f32.mrb[7].mxu0  ;;  %v704_v4 = vpop.f32.mrb[5].mxu1 }
 0x105   : > { %v767_v1 = vpack.c.bf16 %v752_v60, %v751_v59  ;;  %v600_v2 = vadd.f32 %v1441_v61, %v1887_v44  ;;  %v1444_v3 = vadd.f32 %v1443_v63, %v1442_v62  ;;  %v1548_v5 = vpop.f32.mrb[6].mxu1 }
 0x106   : > { %v707_v8 = vpop.f32.mrb[7].mxu1 }
 0x107   : > { %v697_v6 = vadd.f32 %v1543_v48, %v600_v2  ;;  %v603_v7 = vadd.f32 %v1444_v3, %v1887_v44  ;;  %1573 = vmatprep.mubr.bf16.mxu1 %v767_v1 }
 0x109   : > { %v700_v9 = vadd.f32 %v1544_v52, %v603_v7  ;;  %v1445_v10 = vpop.f32.mrb[8].mxu0  ;;  %v753_v12 = vmax.f32 %v697_v6, 0.0 }
 0x10a   : > { %v1446_v11 = vpop.f32.mrb[9].mxu0 }
 0x10b   : > { %v754_v13 = vmax.f32 %v700_v9, 0.0  ;;  %v1447_v14 = vadd.f32 %v1446_v11, %v1445_v10  ;;  %v1448_v15 = vpop.f32.mrb[10].mxu0  ;;  %v1551_v17 = vpop.f32.mrb[8].mxu1 }
 0x10c   : > { %v1449_v16 = vpop.f32.mrb[11].mxu0  ;;  %v720_v21 = vpop.f32.mrb[9].mxu1 }
 0x10d   : > { %v768_v18 = vpack.c.bf16 %v754_v13, %v753_v12  ;;  %v1450_v19 = vadd.f32 %v1449_v16, %v1448_v15  ;;  %v608_v20 = vadd.f32 %v1447_v14, %v1887_v44  ;;  %v1552_v22 = vpop.f32.mrb[10].mxu1 }
 0x10e   : > { %v723_v25 = vpop.f32.mrb[11].mxu1 }
 0x10f   : > { %v705_v23 = vadd.f32 %v704_v4, %v608_v20  ;;  %1574 = vmatmul.mubr.bf16.vlgmr.msra.gmra.mrb[16].mxu1 %v768_v18  ;;  %v611_v24 = vadd.f32 %v1450_v19, %v1887_v44 }
 0x110   : > { %1617 = vmatpush3.bf16.msra.mxu1 %v1662_v40 }
 0x111   : > { %v708_v26 = vadd.f32 %v707_v8, %v611_v24  ;;  %v1451_v27 = vpop.f32.mrb[12].mxu0  ;;  %1614 = vmatprep.subr.bf16.mxu1 %v1880_v41  ;;  %v755_v29 = vmax.f32 %v705_v23, 0.0 }
 0x112   : > { %v1452_v28 = vpop.f32.mrb[13].mxu0 }
 0x113   : > { %v756_v30 = vmax.f32 %v708_v26, 0.0  ;;  %v1453_v31 = vadd.f32 %v1452_v28, %v1451_v27  ;;  %v1454_v32 = vpop.f32.mrb[14].mxu0  ;;  %v1896_v34 = vpop.f32.mrb[12].mxu1 }
 0x114   : > { %v1455_v33 = vpop.f32.mrb[15].mxu0  ;;  %1618 = vmatpush3.bf16.msra.mxu1 %v1880_v41  ;;  %v736_v38 = vpop.f32.mrb[13].mxu1 }
 0x115   : > { %v769_v35 = vpack.c.bf16 %v756_v30, %v755_v29  ;;  %v616_v36 = vadd.f32 %v1453_v31, %v1887_v44  ;;  %v1456_v37 = vadd.f32 %v1455_v33, %v1454_v32  ;;  %v1556_v39 = vpop.f32.mrb[14].mxu1 }
 0x116   : > { %v739_v43 = vpop.f32.mrb[15].mxu1 }
 0x117   : > { %v713_v40 = vadd.f32 %v1547_v0, %v616_v36  ;;  %v619_v42 = vadd.f32 %v1456_v37, %v1887_v44  ;;  %1577 = vmatprep.mubr.bf16.mxu1 %v769_v35  ;;  %v1664_v37 = vld [vmem:[%s1952_s5 + $0x10] sm:$0xff]  }
 0x118   : > { %1593 = vmatprep.subr.bf16.mxu0 %v1664_v37  ;;  %1615 = vmatprep.subr.bf16.mxu1 %v1664_v37 }
 0x119   : > { %v716_v45 = vadd.f32 %v1548_v5, %v619_v42  ;;  %v1457_v46 = vpop.f32.mrb[16].mxu0  ;;  %v757_v48 = vmax.f32 %v713_v40, 0.0  ;;  %1594 = vmatpush3.bf16.msra.mxu0 %v1664_v37  ;;  %1619 = vmatpush3.bf16.msra.mxu1 %v1664_v37 }
 0x11a   : > { %v1458_v47 = vpop.f32.mrb[17].mxu0 }
 0x11b   : > { %v758_v49 = vmax.f32 %v716_v45, 0.0  ;;  %v1459_v50 = vadd.f32 %v1458_v47, %v1457_v46  ;;  %v1460_v51 = vpop.f32.mrb[18].mxu0 }
 0x11c   : > { %v1461_v52 = vpop.f32.mrb[19].mxu0 }
 0x11d   : > { %v1462_v41 = vadd.f32 %v1461_v52, %v1460_v51  ;;  %v624_v53 = vadd.f32 %v1459_v50, %v1887_v44  ;;  %v770_v54 = vpack.c.bf16 %v758_v49, %v757_v48 }
 0x11f   : > { %v721_v55 = vadd.f32 %v720_v21, %v624_v53  ;;  %1578 = vmatmul.mubr.bf16.gmra.mrb[20].mxu1 %v770_v54  ;;  %v627_v56 = vadd.f32 %v1462_v41, %v1887_v44 }
 0x121   : > { %v724_v57 = vadd.f32 %v723_v25, %v627_v56  ;;  %v1463_v58 = vpop.f32.mrb[20].mxu0  ;;  %v759_v60 = vmax.f32 %v721_v55, 0.0 }
 0x122   : > { %v1464_v59 = vpop.f32.mrb[21].mxu0 }
 0x123   : > { %v760_v61 = vmax.f32 %v724_v57, 0.0  ;;  %v1465_v62 = vadd.f32 %v1464_v59, %v1463_v58  ;;  %v1466_v63 = vpop.f32.mrb[22].mxu0 }
 0x124   : > { %v1467_v0 = vpop.f32.mrb[23].mxu0 }
 0x125   : > { %v771_v1 = vpack.c.bf16 %v760_v61, %v759_v60  ;;  %v632_v2 = vadd.f32 %v1465_v62, %v1887_v44  ;;  %v1468_v3 = vadd.f32 %v1467_v0, %v1466_v63 }
 0x127   : > { %v729_v4 = vadd.f32 %v1551_v17, %v632_v2  ;;  %v635_v5 = vadd.f32 %v1468_v3, %v1887_v44  ;;  %1581 = vmatprep.mubr.bf16.mxu1 %v771_v1 }
 0x129   : > { %v732_v6 = vadd.f32 %v1552_v22, %v635_v5  ;;  %v1469_v7 = vpop.f32.mrb[24].mxu0  ;;  %v761_v9 = vmax.f32 %v729_v4, 0.0 }
 0x12a   : > { %v1470_v8 = vpop.f32.mrb[25].mxu0 }
 0x12b   : > { %v762_v10 = vmax.f32 %v732_v6, 0.0  ;;  %v1471_v11 = vadd.f32 %v1470_v8, %v1469_v7  ;;  %v1472_v12 = vpop.f32.mrb[26].mxu0 }
 0x12c   : > { %v1473_v13 = vpop.f32.mrb[27].mxu0 }
 0x12d   : > { %v1474_v14 = vadd.f32 %v1473_v13, %v1472_v12  ;;  %v640_v15 = vadd.f32 %v1471_v11, %v1887_v44  ;;  %v772_v16 = vpack.c.bf16 %v762_v10, %v761_v9 }
 0x12f   : > { %v737_v18 = vadd.f32 %v736_v38, %v640_v15  ;;  %1582 = vmatmul.mubr.bf16.gmra.mrb[24].mxu1 %v772_v16  ;;  %v643_v19 = vadd.f32 %v1474_v14, %v1887_v44 }
 0x131   : > { %v740_v17 = vadd.f32 %v739_v43, %v643_v19  ;;  %v1475_v20 = vpop.f32.mrb[28].mxu0  ;;  %v763_v23 = vmax.f32 %v737_v18, 0.0 }
 0x132   : > { %v1476_v21 = vpop.f32.mrb[29].mxu0 }
 0x133   : > { %v764_v22 = vmax.f32 %v740_v17, 0.0  ;;  %v1477_v24 = vadd.f32 %v1476_v21, %v1475_v20  ;;  %v1478_v25 = vpop.f32.mrb[30].mxu0 }
 0x134   : > { %v1479_v26 = vpop.f32.mrb[31].mxu0 }
 0x135   : > { %v773_v27 = vpack.c.bf16 %v764_v22, %v763_v23  ;;  %v648_v28 = vadd.f32 %v1477_v24, %v1887_v44  ;;  %v1480_v29 = vadd.f32 %v1479_v26, %v1478_v25 }
 0x137   : > { %v745_v30 = vadd.f32 %v1896_v34, %v648_v28  ;;  %v651_v31 = vadd.f32 %v1480_v29, %v1887_v44  ;;  %1585 = vmatprep.mubr.bf16.mxu1 %v773_v27  ;;  %v1665_v34 = vld [vmem:[%s1952_s5 + $0x18] sm:$0xff]   ;;  %v1314_v44 = vld [vmem:[%s1951_s4] ss:$0 sm:$0xff] }
 0x138   : > { %1595 = vmatprep.subr.bf16.mxu0 %v1665_v34  ;;  %1616 = vmatprep.subr.bf16.mxu1 %v1665_v34 }
 0x139   : > { %v748_v32 = vadd.f32 %v1556_v39, %v651_v31  ;;  %v765_v33 = vmax.f32 %v745_v30, 0.0  ;;  %1596 = vmatpush3.bf16.msra.mxu0 %v1665_v34  ;;  %1620 = vmatpush3.bf16.msra.mxu1 %v1665_v34  ;;  %v1323_v31 = vld [vmem:[%s1953_s6] ss:$0 sm:$0xff] }
 0x13b   : > { %v766_v35 = vmax.f32 %v748_v32, 0.0 }
 0x13d   : > { %v774_v36 = vpack.c.bf16 %v766_v35, %v765_v33 }
 0x13f   : > { %1586 = vmatmul.mubr.bf16.gmra.mrb[28].mxu1 %v774_v36 }
 0x1e2   : > { %v1575_v38 = vpop.f32.mrb[16].mxu1 }
 0x1e3   : > { %v889_v39 = vadd.f32 %v1575_v38, %v1314_v44  ;;  %v880_v40 = vpop.f32.mrb[17].mxu1 }
 0x1e4   : > { %v881_v42 = vadd.f32 %v1314_v44, %v880_v40  ;;  %v1576_v43 = vpop.f32.mrb[18].mxu1 }
 0x1e5   : > { %v892_v45 = vadd.f32 %v1576_v43, %v1314_v44  ;;  %v883_v46 = vpop.f32.mrb[19].mxu1  ;;  %v945_v48 = vmax.f32 %v889_v39, 0.0 }
 0x1e6   : > { %v884_v47 = vadd.f32 %v1314_v44, %v883_v46  ;;  %v943_v50 = vmax.f32 %v881_v42, 0.0 }
 0x1e7   : > { %v946_v49 = vmax.f32 %v892_v45, 0.0 }
 0x1e8   : > { %v944_v51 = vmax.f32 %v884_v47, 0.0 }
 0x1e9   : > { %v960_v52 = vpack.c.bf16 %v946_v49, %v945_v48 }
 0x1ea   : > { %v959_v41 = vpack.c.bf16 %v944_v51, %v943_v50 }
 0x1ec   : > { %1597 = vmatprep.mubr.msk.bf16.mxu0 %vm1006_vm0, %v959_v41 }
 0x1ed   : > { %1598 = vmatmul.mubr.msk.bf16.vlgmr.msra.gmra.mrb[32].mxu0 %vm1006_vm0, %v960_v52 }
 0x1f2   : > { %v1579_v53 = vpop.f32.mrb[20].mxu1 }
 0x1f3   : > { %v905_v54 = vadd.f32 %v1579_v53, %v1314_v44  ;;  %v896_v55 = vpop.f32.mrb[21].mxu1 }
 0x1f4   : > { %v897_v56 = vadd.f32 %v1314_v44, %v896_v55  ;;  %v1580_v57 = vpop.f32.mrb[22].mxu1 }
 0x1f5   : > { %v908_v58 = vadd.f32 %v1580_v57, %v1314_v44  ;;  %v899_v59 = vpop.f32.mrb[23].mxu1  ;;  %v949_v61 = vmax.f32 %v905_v54, 0.0 }
 0x1f6   : > { %v900_v60 = vadd.f32 %v1314_v44, %v899_v59  ;;  %v947_v63 = vmax.f32 %v897_v56, 0.0 }
 0x1f7   : > { %v950_v62 = vmax.f32 %v908_v58, 0.0 }
 0x1f8   : > { %v948_v0 = vmax.f32 %v900_v60, 0.0 }
 0x1f9   : > { %v962_v1 = vpack.c.bf16 %v950_v62, %v949_v61 }
 0x1fa   : > { %v961_v2 = vpack.c.bf16 %v948_v0, %v947_v63 }
 0x1fc   : > { %1601 = vmatprep.mubr.msk.bf16.mxu0 %vm1006_vm0, %v961_v2 }
 0x1fd   : > { %1602 = vmatmul.mubr.msk.bf16.gmra.mrb[36].mxu0 %vm1006_vm0, %v962_v1 }
 0x202   : > { %v1583_v3 = vpop.f32.mrb[24].mxu1 }
 0x203   : > { %v921_v4 = vadd.f32 %v1583_v3, %v1314_v44  ;;  %v912_v5 = vpop.f32.mrb[25].mxu1 }
 0x204   : > { %v913_v6 = vadd.f32 %v1314_v44, %v912_v5  ;;  %v1584_v7 = vpop.f32.mrb[26].mxu1 }
 0x205   : > { %v924_v8 = vadd.f32 %v1584_v7, %v1314_v44  ;;  %v915_v9 = vpop.f32.mrb[27].mxu1  ;;  %v953_v11 = vmax.f32 %v921_v4, 0.0 }
 0x206   : > { %v916_v10 = vadd.f32 %v1314_v44, %v915_v9  ;;  %v951_v13 = vmax.f32 %v913_v6, 0.0 }
 0x207   : > { %v954_v12 = vmax.f32 %v924_v8, 0.0 }
 0x208   : > { %v952_v14 = vmax.f32 %v916_v10, 0.0 }
 0x209   : > { %v964_v15 = vpack.c.bf16 %v954_v12, %v953_v11 }
 0x20a   : > { %v963_v16 = vpack.c.bf16 %v952_v14, %v951_v13 }
 0x20c   : > { %1605 = vmatprep.mubr.msk.bf16.mxu1 %vm1006_vm0, %v963_v16 }
 0x20d   : > { %1606 = vmatmul.mubr.msk.bf16.vlgmr.msra.gmra.mrb[32].mxu1 %vm1006_vm0, %v964_v15 }
 0x212   : > { %v1587_v18 = vpop.f32.mrb[28].mxu1 }
 0x213   : > { %v937_v19 = vadd.f32 %v1587_v18, %v1314_v44  ;;  %v928_v17 = vpop.f32.mrb[29].mxu1 }
 0x214   : > { %v929_v20 = vadd.f32 %v1314_v44, %v928_v17  ;;  %v1588_v21 = vpop.f32.mrb[30].mxu1 }
 0x215   : > { %v940_v23 = vadd.f32 %v1588_v21, %v1314_v44  ;;  %v931_v22 = vpop.f32.mrb[31].mxu1  ;;  %v957_v25 = vmax.f32 %v937_v19, 0.0 }
 0x216   : > { %v932_v24 = vadd.f32 %v1314_v44, %v931_v22  ;;  %v955_v27 = vmax.f32 %v929_v20, 0.0 }
 0x217   : > { %v958_v26 = vmax.f32 %v940_v23, 0.0 }
 0x218   : > { %v956_v28 = vmax.f32 %v932_v24, 0.0 }
 0x219   : > { %v966_v29 = vpack.c.bf16 %v958_v26, %v957_v25 }
 0x21a   : > { %v965_v30 = vpack.c.bf16 %v956_v28, %v955_v27 }
 0x21c   : > { %1609 = vmatprep.mubr.msk.bf16.mxu1 %vm1006_vm0, %v965_v30 }
 0x21d   : > { %1610 = vmatmul.mubr.msk.bf16.gmra.mrb[36].mxu1 %vm1006_vm0, %v966_v29 }
 0x2c0   : > { %v1599_v32 = vpop.f32.mrb[32].mxu0 }
 0x2c1   : > { %v1074_v33 = vadd.f32 %v1599_v32, %v1323_v31  ;;  %v1065_v35 = vpop.f32.mrb[33].mxu0 }
 0x2c2   : > { %v1066_v36 = vadd.f32 %v1323_v31, %v1065_v35  ;;  %v1600_v37 = vpop.f32.mrb[34].mxu0 }
 0x2c3   : > { %v1077_v34 = vadd.f32 %v1600_v37, %v1323_v31  ;;  %v1068_v44 = vpop.f32.mrb[35].mxu0  ;;  %v1130_v39 = vmax.f32 %v1074_v33, 0.0 }
 0x2c4   : > { %v1069_v38 = vadd.f32 %v1323_v31, %v1068_v44  ;;  %v1128_v42 = vmax.f32 %v1066_v36, 0.0 }
 0x2c5   : > { %v1131_v40 = vmax.f32 %v1077_v34, 0.0 }
 0x2c6   : > { %v1129_v43 = vmax.f32 %v1069_v38, 0.0 }
 0x2c7   : > { %v1378_v45 = vpack.c.bf16 %v1131_v40, %v1130_v39 }
 0x2c8   : > { %v1373_v46 = vpack.c.bf16 %v1129_v43, %v1128_v42 }
 0x2c9   : > { %1410 = vst [vmem:[%s1934_s25 + $0x8] sm:$0xff] %v1378_v45  }
 0x2ca   : > { %1374 = vst [vmem:[%s1934_s25] sm:$0xff] %v1373_v46  }
 0x2d0   : > { %v1603_v47 = vpop.f32.mrb[36].mxu0 }
 0x2d1   : > { %v1090_v48 = vadd.f32 %v1603_v47, %v1323_v31  ;;  %v1081_v49 = vpop.f32.mrb[37].mxu0 }
 0x2d2   : > { %v1082_v50 = vadd.f32 %v1323_v31, %v1081_v49  ;;  %v1604_v51 = vpop.f32.mrb[38].mxu0 }
 0x2d3   : > { %v1093_v52 = vadd.f32 %v1604_v51, %v1323_v31  ;;  %v1084_v41 = vpop.f32.mrb[39].mxu0  ;;  %v1134_v54 = vmax.f32 %v1090_v48, 0.0 }
 0x2d4   : > { %v1085_v53 = vadd.f32 %v1323_v31, %v1084_v41  ;;  %v1132_v56 = vmax.f32 %v1082_v50, 0.0 }
 0x2d5   : > { %v1135_v55 = vmax.f32 %v1093_v52, 0.0 }
 0x2d6   : > { %v1133_v57 = vmax.f32 %v1085_v53, 0.0 }
 0x2d7   : > { %v1388_v58 = vpack.c.bf16 %v1135_v55, %v1134_v54 }
 0x2d8   : > { %v1383_v59 = vpack.c.bf16 %v1133_v57, %v1132_v56 }
 0x2d9   : > { %1412 = vst [vmem:[%s1934_s25 + $0x18] sm:$0xff] %v1388_v58  }
 0x2da   : > { %1411 = vst [vmem:[%s1934_s25 + $0x10] sm:$0xff] %v1383_v59  }
 0x2e0   : > { %v1607_v60 = vpop.f32.mrb[32].mxu1 }
 0x2e1   : > { %v1106_v61 = vadd.f32 %v1607_v60, %v1323_v31  ;;  %v1097_v62 = vpop.f32.mrb[33].mxu1 }
 0x2e2   : > { %v1098_v63 = vadd.f32 %v1323_v31, %v1097_v62  ;;  %v1608_v0 = vpop.f32.mrb[34].mxu1 }
 0x2e3   : > { %v1109_v1 = vadd.f32 %v1608_v0, %v1323_v31  ;;  %v1100_v2 = vpop.f32.mrb[35].mxu1  ;;  %v1138_v4 = vmax.f32 %v1106_v61, 0.0 }
 0x2e4   : > { %v1101_v3 = vadd.f32 %v1323_v31, %v1100_v2  ;;  %v1136_v6 = vmax.f32 %v1098_v63, 0.0 }
 0x2e5   : > { %v1139_v5 = vmax.f32 %v1109_v1, 0.0 }
 0x2e6   : > { %v1137_v7 = vmax.f32 %v1101_v3, 0.0 }
 0x2e7   : > { %v1398_v8 = vpack.c.bf16 %v1139_v5, %v1138_v4 }
 0x2e8   : > { %v1393_v9 = vpack.c.bf16 %v1137_v7, %v1136_v6 }
 0x2e9   : > { %1414 = vst [vmem:[%s1934_s25 + $0x28] sm:$0xff] %v1398_v8  }
 0x2ea   : > { %1413 = vst [vmem:[%s1934_s25 + $0x20] sm:$0xff] %v1393_v9  }
 0x2f0   : > { %v1611_v10 = vpop.f32.mrb[36].mxu1 }
 0x2f1   : > { %v1122_v11 = vadd.f32 %v1611_v10, %v1323_v31  ;;  %v1113_v12 = vpop.f32.mrb[37].mxu1 }
 0x2f2   : > { %v1114_v13 = vadd.f32 %v1323_v31, %v1113_v12  ;;  %v1612_v14 = vpop.f32.mrb[38].mxu1 }
 0x2f3   : > { %v1125_v15 = vadd.f32 %v1612_v14, %v1323_v31  ;;  %v1116_v16 = vpop.f32.mrb[39].mxu1  ;;  %v1142_v19 = vmax.f32 %v1122_v11, 0.0 }
 0x2f4   : > { %v1117_v18 = vadd.f32 %v1323_v31, %v1116_v16  ;;  %v1140_v20 = vmax.f32 %v1114_v13, 0.0 }
 0x2f5   : > { %v1143_v17 = vmax.f32 %v1125_v15, 0.0 }
 0x2f6   : > { %v1141_v21 = vmax.f32 %v1117_v18, 0.0 }
 0x2f7   : > { %v1408_v23 = vpack.c.bf16 %v1143_v17, %v1142_v19 }
 0x2f8   : > { %v1403_v22 = vpack.c.bf16 %v1141_v21, %v1140_v20 }
 0x2f9   : > { %1416 = vst [vmem:[%s1934_s25 + $0x38] sm:$0xff] %v1408_v23  }
 0x2fa   : > { %1415 = vst [vmem:[%s1934_s25 + $0x30] sm:$0xff] %v1403_v22  }
 0x2fb PF: > { %s17_s24 = sadd.s32 1, %s1672_s24  }
 0x2fc   : > { %p14_p4 = scmp.ge.s32.totalorder %s17_s24, 4  }
 0x2fe   :  { %16 = sbr.rel (!%p14_p4) target bundleno = 1 (0x1), region = 78 }

</bundles_post_ra>
